<compile_context>
chip_gen: v5e
topology: v5e:2x2
jax: 0.10.0
libtpu: 0.0.40
codegen_flags: <defaults>
</compile_context>

<pallas_src>
from functools import partial

import jax
import jax.numpy as jnp
import numpy as np
from jax.experimental import pallas as pl
from jax.experimental.pallas import tpu as pltpu


def ntm_write_head_kernel(emb_ref, wT_ref, b_ref, wr_ref, wu_ref, mem_ref,
                          w_out_ref, mem_out_ref):
    # Per-grid-step (one batch row) refs:
    #   emb_ref (1,1,C)  wT_ref (C,M+1)  b_ref (1,M+1)  wr_ref (1,1,N)  wu_ref (1,N)
    #   mem_ref / mem_out_ref (1,M,N)  w_out_ref (1,1,N)
    M = mem_ref.shape[1]
    N = mem_ref.shape[2]

    # Fused fc_write: one tiny MXU matmul producing [k | beta]; beta sliced in-kernel.
    o = jnp.dot(emb_ref[0], wT_ref[...],
                preferred_element_type=jnp.float32) + b_ref[...]           # (1, M+1)
    k = o[:, :M]                                                           # (1, M)
    alpha = jax.nn.sigmoid(o[:, M:M + 1])                                  # (1, 1)

    # w_lu: one-hot of the FIRST argmin of the shared usage vector (matches torch.min(0)).
    wu = wu_ref[...].astype(jnp.float32)                                   # (1, N) lane-major
    lane = jax.lax.broadcasted_iota(jnp.int32, wu.shape, 1)
    min_val = jnp.min(wu, axis=1, keepdims=True)
    first_idx = jnp.min(jnp.where(wu == min_val, lane, jnp.int32(N)),
                        axis=1, keepdims=True)                             # (1, 1)
    w_lu = (lane == first_idx).astype(jnp.float32)                         # (1, N)

    # LRU write addressing, entirely lane-major: w = α * w_r_prev + (1-α) * w_lu
    w = alpha * wr_ref[0].astype(jnp.float32) + (1.0 - alpha) * w_lu       # (1, N)
    w_out_ref[0] = w.astype(w_out_ref.dtype)

    # Memory write in lane-dense (B, M, N) layout: mem[m, n] += k[m] * w[n].
    # w broadcasts along sublanes for free; only the tiny (1, M) k is relaid out.
    # f32 accumulation; cast back to the storage dtype (e.g. bf16) on store.
    upd = mem_ref[...].astype(jnp.float32) + k[:, :, None] * w[:, None, :]  # (1, M, N)
    mem_out_ref[...] = upd.astype(mem_out_ref.dtype)


@partial(jax.jit, donate_argnums=(5,))
def ntm_write_head(embeddings, W, b, w_r_prev, w_u, memory):
    """NTMWriteHead forward.

    Args:
      embeddings: (B, C) controller output.
      W: (M+1, C) fc_write weight.   b: (M+1,) fc_write bias.
      w_r_prev:  (B, N) previous read weights.
      w_u:       (N,)  shared usage vector.
      memory:    (B, M, N) memory stored LANE-DENSE (N on lanes). Donated & updated in place.

    Returns: (w (B, N) float32, memory_new (B, M, N) memory.dtype).
    """
    B, C = embeddings.shape
    _, M, N = memory.shape

    # Glue (tiny arrays only — `memory` is passed through untouched so donation/aliasing holds).
    emb3 = embeddings.reshape(B, 1, C).astype(jnp.float32)
    wr3 = w_r_prev.reshape(B, 1, N).astype(jnp.float32)
    wu2 = w_u.reshape(1, N).astype(jnp.float32)
    wT = W.T.astype(jnp.float32)                         # (C, M+1): [k-cols | beta-col]
    b2 = b.reshape(1, M + 1).astype(jnp.float32)

    w3, mem_out = pl.pallas_call(
        ntm_write_head_kernel,
        out_shape=(jax.ShapeDtypeStruct((B, 1, N), jnp.float32),
                   jax.ShapeDtypeStruct((B, M, N), memory.dtype)),
        grid=(B,),
        in_specs=[
            pl.BlockSpec((1, 1, C), lambda i: (i, 0, 0)),      # embeddings (per batch row)
            pl.BlockSpec((C, M + 1), lambda i: (0, 0)),        # fused weight (replicated)
            pl.BlockSpec((1, M + 1), lambda i: (0, 0)),        # bias (replicated)
            pl.BlockSpec((1, 1, N), lambda i: (i, 0, 0)),      # w_r_prev (per batch row)
            pl.BlockSpec((1, N), lambda i: (0, 0)),            # w_u (replicated)
            pl.BlockSpec((1, M, N), lambda i: (i, 0, 0)),      # memory tile (per batch row)
        ],
        out_specs=(
            pl.BlockSpec((1, 1, N), lambda i: (i, 0, 0)),
            pl.BlockSpec((1, M, N), lambda i: (i, 0, 0)),
        ),
        input_output_aliases={5: 1},   # memory updated in place (paired with donate_argnums)
        compiler_params=pltpu.CompilerParams(dimension_semantics=("parallel",)),
    )(emb3, wT, b2, wr3, wu2, memory)

    return w3.reshape(B, N), mem_out


def _reference(emb, W, b, w_r_prev, w_u, memory_bmn, M):
    """Pure-JAX reference (memory in the same lane-dense (B, M, N) layout)."""
    o = emb @ W.T + b
    k, beta = o[:, :M], o[:, M:M + 1]
    alpha = jax.nn.sigmoid(beta)
    idx = jnp.argmin(w_u)
    w_lu = (jnp.arange(w_u.shape[0]) == idx).astype(jnp.float32)
    w = alpha * w_r_prev + (1.0 - alpha) * w_lu[None, :]
    mem_new = memory_bmn + k[:, :, None] * w[:, None, :]     # mem[b,m,n] += k[b,m]*w[b,n]
    return w, mem_new


if __name__ == "__main__":
    B, C = 2, 32          # batch, controller_size
    N, M = 16, 24         # memory rows / memory width

    key = jax.random.PRNGKey(0)
    k_w, k_b, k_e, k_r, k_u, k_m = jax.random.split(key, 6)

    # fc_write parameters: xavier_uniform(gain=1.4) weight (M+1, C), normal(std=0.01) bias.
    gain = 1.4
    bound = gain * np.sqrt(6.0 / (C + (M + 1)))
    W = jax.random.uniform(k_w, (M + 1, C), jnp.float32, -bound, bound)
    b = 0.01 * jax.random.normal(k_b, (M + 1,), jnp.float32)

    embeddings = jax.random.normal(k_e, (B, C), jnp.float32)
    w_r_prev = jax.nn.softmax(jax.random.normal(k_r, (B, N), jnp.float32), axis=-1)
    w_u = jax.random.uniform(k_u, (N,), jnp.float32)
    # Memory stored lane-dense as (B, M, N): N sits on the lane axis.
    memory_f32 = jax.random.normal(k_m, (B, M, N), jnp.float32)
    memory_bf16 = memory_f32.astype(jnp.bfloat16)

    # References computed BEFORE the kernel calls (memory buffers are donated/consumed).
    w_ref, mem_ref_new = _reference(embeddings, W, b, w_r_prev, w_u, memory_f32, M)
    _, mem_ref_new_bf16 = _reference(embeddings, W, b, w_r_prev, w_u,
                                     memory_bf16.astype(jnp.float32), M)
    jax.block_until_ready((w_ref, mem_ref_new, mem_ref_new_bf16))

    # f32-storage path.
    w_out, mem_out = ntm_write_head(embeddings, W, b, w_r_prev, w_u, memory_f32)
    jax.block_until_ready((w_out, mem_out))
    assert np.allclose(np.asarray(w_out), np.asarray(w_ref), atol=1e-5, rtol=1e-5)
    assert np.allclose(np.asarray(mem_out), np.asarray(mem_ref_new), atol=1e-5, rtol=1e-5)

    # bf16-storage path (half the HBM bytes on the dominant array; f32 accumulate in-kernel).
    w_out16, mem_out16 = ntm_write_head(embeddings, W, b, w_r_prev, w_u, memory_bf16)
    jax.block_until_ready((w_out16, mem_out16))
    assert np.allclose(np.asarray(w_out16), np.asarray(w_ref), atol=1e-5, rtol=1e-5)
    assert np.allclose(np.asarray(mem_out16, dtype=np.float32),
                       np.asarray(mem_ref_new_bf16), atol=3e-2, rtol=3e-2)

    print("KERNEL_OK")
</pallas_src>

<mosaic_0001>
module attributes {stable_mosaic.version = 11 : i64} {
  func.func @ntm_write_head_kernel(%arg0: i32, %arg1: memref<1x1x32xf32, #tpu.memory_space<vmem>>, %arg2: memref<32x25xf32, #tpu.memory_space<vmem>>, %arg3: memref<1x25xf32, #tpu.memory_space<vmem>>, %arg4: memref<1x1x16xf32, #tpu.memory_space<vmem>>, %arg5: memref<1x16xf32, #tpu.memory_space<vmem>>, %arg6: memref<1x24x16xf32, #tpu.memory_space<vmem>>, %arg7: memref<1x1x16xf32, #tpu.memory_space<vmem>>, %arg8: memref<1x24x16xf32, #tpu.memory_space<vmem>>) attributes {dimension_semantics = [#tpu.dimension_semantics<parallel>], iteration_bounds = array<i64: 2>, scalar_prefetch = 0 : i64, scratch_operands = 0 : i64, tpu.core_type = #tpu.core_type<tc>, window_params = [{transform_indices = @transform_0, window_bounds = array<i64: 1, 1, 32>}, {pipeline_mode = #tpu.pipeline_mode<synchronous>, transform_indices = @transform_1, window_bounds = array<i64: 32, 25>}, {pipeline_mode = #tpu.pipeline_mode<synchronous>, transform_indices = @transform_2, window_bounds = array<i64: 1, 25>}, {transform_indices = @transform_3, window_bounds = array<i64: 1, 1, 16>}, {pipeline_mode = #tpu.pipeline_mode<synchronous>, transform_indices = @transform_4, window_bounds = array<i64: 1, 16>}, {transform_indices = @transform_5, window_bounds = array<i64: 1, 24, 16>}, {transform_indices = @transform_6, window_bounds = array<i64: 1, 1, 16>}, {transform_indices = @transform_7, window_bounds = array<i64: 1, 24, 16>}]} {
    %c0 = arith.constant 0 : index
    %c0_0 = arith.constant 0 : index
    %c0_1 = arith.constant 0 : index
    %0 = vector.load %arg1[%c0, %c0_0, %c0_1] : memref<1x1x32xf32, #tpu.memory_space<vmem>>, vector<1x1x32xf32>
    %1 = vector.shape_cast %0 : vector<1x1x32xf32> to vector<1x32xf32>
    %c0_2 = arith.constant 0 : index
    %c0_3 = arith.constant 0 : index
    %2 = vector.load %arg2[%c0_2, %c0_3] : memref<32x25xf32, #tpu.memory_space<vmem>>, vector<32x25xf32>
    %cst = arith.constant dense<0.000000e+00> : vector<1x25xf32>
    %3 = tpu.matmul %1, %2, %cst {dimension_numbers = #tpu.dot_dimension_numbers<[1], [0], [0], [1], [0, 0, 1, 1], [], []>} : vector<1x32xf32>, vector<32x25xf32>, vector<1x25xf32> -> vector<1x25xf32>
    %c0_4 = arith.constant 0 : index
    %c0_5 = arith.constant 0 : index
    %4 = vector.load %arg3[%c0_4, %c0_5] : memref<1x25xf32, #tpu.memory_space<vmem>>, vector<1x25xf32>
    %5 = arith.addf %3, %4 : vector<1x25xf32>
    %6 = vector.extract_strided_slice %5 {offsets = [0, 0], sizes = [1, 24], strides = [1, 1]} : vector<1x25xf32> to vector<1x24xf32>
    %7 = vector.extract_strided_slice %5 {offsets = [0, 24], sizes = [1, 1], strides = [1, 1]} : vector<1x25xf32> to vector<1x1xf32>
    %8 = arith.negf %7 : vector<1x1xf32>
    %9 = math.exp %8 : vector<1x1xf32>
    %cst_6 = arith.constant 1.000000e+00 : f32
    %10 = vector.broadcast %cst_6 : f32 to vector<1x1xf32>
    %11 = arith.addf %10, %9 : vector<1x1xf32>
    %12 = arith.divf %10, %11 : vector<1x1xf32>
    %c0_7 = arith.constant 0 : index
    %c0_8 = arith.constant 0 : index
    %13 = vector.load %arg5[%c0_7, %c0_8] : memref<1x16xf32, #tpu.memory_space<vmem>>, vector<1x16xf32>
    %14 = tpu.iota {dimensions = array<i32: 1>} : vector<1x16xi32>
    %cst_9 = arith.constant dense<0x7F800000> : vector<1xf32>
    %15 = vector.multi_reduction <minimumf>, %13, %cst_9 [1] : vector<1x16xf32> to vector<1xf32>
    %16 = vector.shape_cast %15 : vector<1xf32> to vector<1x1xf32>
    %17 = vector.broadcast %16 : vector<1x1xf32> to vector<1x16xf32>
    %18 = arith.cmpf oeq, %13, %17 : vector<1x16xf32>
    %c16_i32 = arith.constant 16 : i32
    %19 = vector.broadcast %c16_i32 : i32 to vector<1x16xi32>
    %20 = arith.select %18, %14, %19 : vector<1x16xi1>, vector<1x16xi32>
    %cst_10 = arith.constant dense<2147483647> : vector<1xi32>
    %21 = vector.multi_reduction <minsi>, %20, %cst_10 [1] : vector<1x16xi32> to vector<1xi32>
    %22 = vector.shape_cast %21 : vector<1xi32> to vector<1x1xi32>
    %23 = vector.broadcast %22 : vector<1x1xi32> to vector<1x16xi32>
    %24 = arith.cmpi eq, %14, %23 : vector<1x16xi32>
    %25 = arith.extui %24 : vector<1x16xi1> to vector<1x16xi32>
    %26 = arith.sitofp %25 : vector<1x16xi32> to vector<1x16xf32>
    %c0_11 = arith.constant 0 : index
    %c0_12 = arith.constant 0 : index
    %c0_13 = arith.constant 0 : index
    %27 = vector.load %arg4[%c0_11, %c0_12, %c0_13] : memref<1x1x16xf32, #tpu.memory_space<vmem>>, vector<1x1x16xf32>
    %28 = vector.shape_cast %27 : vector<1x1x16xf32> to vector<1x16xf32>
    %29 = vector.broadcast %12 : vector<1x1xf32> to vector<1x16xf32>
    %30 = arith.mulf %29, %28 : vector<1x16xf32>
    %cst_14 = arith.constant 1.000000e+00 : f32
    %31 = vector.broadcast %cst_14 : f32 to vector<1x1xf32>
    %32 = arith.subf %31, %12 : vector<1x1xf32>
    %33 = vector.broadcast %32 : vector<1x1xf32> to vector<1x16xf32>
    %34 = arith.mulf %33, %26 : vector<1x16xf32>
    %35 = arith.addf %30, %34 : vector<1x16xf32>
    %c0_15 = arith.constant 0 : index
    %c0_16 = arith.constant 0 : index
    %c0_17 = arith.constant 0 : index
    %36 = vector.load %arg7[%c0_15, %c0_16, %c0_17] : memref<1x1x16xf32, #tpu.memory_space<vmem>>, vector<1x1x16xf32>
    %37 = vector.shape_cast %36 : vector<1x1x16xf32> to vector<1x16xf32>
    %38 = vector.shape_cast %35 : vector<1x16xf32> to vector<1x1x16xf32>
    tpu.vector_store %arg7[%c0_15, %c0_16, %c0_17], %38 {strides = array<i32>} : memref<1x1x16xf32, #tpu.memory_space<vmem>>, vector<1x1x16xf32>,
    %c0_18 = arith.constant 0 : index
    %c0_19 = arith.constant 0 : index
    %c0_20 = arith.constant 0 : index
    %39 = vector.load %arg6[%c0_18, %c0_19, %c0_20] : memref<1x24x16xf32, #tpu.memory_space<vmem>>, vector<1x24x16xf32>
    %40 = vector.shape_cast %6 : vector<1x24xf32> to vector<1x24x1xf32>
    %41 = vector.shape_cast %35 : vector<1x16xf32> to vector<1x1x16xf32>
    %42 = vector.broadcast %40 : vector<1x24x1xf32> to vector<1x24x16xf32>
    %43 = vector.broadcast %41 : vector<1x1x16xf32> to vector<1x24x16xf32>
    %44 = arith.mulf %42, %43 : vector<1x24x16xf32>
    %45 = arith.addf %39, %44 : vector<1x24x16xf32>
    %c0_21 = arith.constant 0 : index
    %c0_22 = arith.constant 0 : index
    %c0_23 = arith.constant 0 : index
    %46 = vector.load %arg8[%c0_21, %c0_22, %c0_23] : memref<1x24x16xf32, #tpu.memory_space<vmem>>, vector<1x24x16xf32>
    tpu.vector_store %arg8[%c0_21, %c0_22, %c0_23], %45 {strides = array<i32>} : memref<1x24x16xf32, #tpu.memory_space<vmem>>, vector<1x24x16xf32>,
    return
  }
  func.func @transform_0(%arg0: i32) -> (i32, i32, i32) {
    %c0_i32 = arith.constant 0 : i32
    %c0_i32_0 = arith.constant 0 : i32
    %c0_i32_1 = arith.constant 0 : i32
    return %arg0, %c0_i32, %c0_i32_0 : i32, i32, i32
  }
  func.func @transform_1(%arg0: i32) -> (i32, i32) {
    %c0_i32 = arith.constant 0 : i32
    %c0_i32_0 = arith.constant 0 : i32
    %c0_i32_1 = arith.constant 0 : i32
    return %c0_i32, %c0_i32_0 : i32, i32
  }
  func.func @transform_2(%arg0: i32) -> (i32, i32) {
    %c0_i32 = arith.constant 0 : i32
    %c0_i32_0 = arith.constant 0 : i32
    %c0_i32_1 = arith.constant 0 : i32
    return %c0_i32, %c0_i32_0 : i32, i32
  }
  func.func @transform_3(%arg0: i32) -> (i32, i32, i32) {
    %c0_i32 = arith.constant 0 : i32
    %c0_i32_0 = arith.constant 0 : i32
    %c0_i32_1 = arith.constant 0 : i32
    return %arg0, %c0_i32, %c0_i32_0 : i32, i32, i32
  }
  func.func @transform_4(%arg0: i32) -> (i32, i32) {
    %c0_i32 = arith.constant 0 : i32
    %c0_i32_0 = arith.constant 0 : i32
    %c0_i32_1 = arith.constant 0 : i32
    return %c0_i32, %c0_i32_0 : i32, i32
  }
  func.func @transform_5(%arg0: i32) -> (i32, i32, i32) {
    %c0_i32 = arith.constant 0 : i32
    %c0_i32_0 = arith.constant 0 : i32
    %c0_i32_1 = arith.constant 0 : i32
    return %arg0, %c0_i32, %c0_i32_0 : i32, i32, i32
  }
  func.func @transform_6(%arg0: i32) -> (i32, i32, i32) {
    %c0_i32 = arith.constant 0 : i32
    %c0_i32_0 = arith.constant 0 : i32
    %c0_i32_1 = arith.constant 0 : i32
    return %arg0, %c0_i32, %c0_i32_0 : i32, i32, i32
  }
  func.func @transform_7(%arg0: i32) -> (i32, i32, i32) {
    %c0_i32 = arith.constant 0 : i32
    %c0_i32_0 = arith.constant 0 : i32
    %c0_i32_1 = arith.constant 0 : i32
    return %arg0, %c0_i32, %c0_i32_0 : i32, i32, i32
  }
}

</mosaic_0001>

<bundles_post_ra>
// kernel: ntm_write_head.1
= control target key start
LH: loop header
LB: loop body
LE: loop exit
PB: predicated region body
PF: predicated region fallthrough
CT: control target
= control target key end

     0   :  { %13 = vsyncpa [#allocation3], 0  ;;  %s861_s0 = inlined_call_operand.vmem [shape: f32[2,1,32], index: 0, kind: input, shape index: {}]   ;;  %s862_s1 = inlined_call_operand.vmem [shape: f32[32,25], index: 1, kind: input, shape index: {}]   ;;  %s863_s2 = inlined_call_operand.vmem [shape: f32[1,25], index: 2, kind: input, shape index: {}]   ;;  %s864_s3 = inlined_call_operand.vmem [shape: f32[2,1,16], index: 3, kind: input, shape index: {}]   ;;  %s865_s4 = inlined_call_operand.vmem [shape: f32[1,16], index: 4, kind: input, shape index: {}]   ;;  %s866_s5 = inlined_call_operand.vmem [shape: f32[2,24,16], index: 5, kind: input, shape index: {}, may-alias: {5,7}]   ;;  %s867_s6 = inlined_call_operand.hbm [shape: f32[2,1,16], index: 6, kind: output, shape index: {0}]   ;;  %s868_s7 = inlined_call_operand.vmem [shape: f32[2,24,16], index: 7, kind: output, shape index: {1}, may-alias: {5,7}]  }
   0x1   :  { %15 = vsyncpa [#allocation3 + $0x1], 0  ;;  %s730_s24 = smov 0   ;;  %s732_s25 = smov 0  }
   0x2   :  { %s734_s26 = smov 0   ;;  %s736_s27 = smov 0  }
   0x3 LB: > { %s751_s28 = sadd.s32 4294967295, %s686_s27   ;;  %s561_s29 = sadd.s32 4294967294, %s686_s27   ;;  %s686_s27 = sphi %s736_s27, %s874_s27   ;;  %s682_s26 = sphi %s734_s26, %s873_s26   ;;  %s678_s25 = sphi %s732_s25, %s872_s25   ;;  %s674_s24 = sphi %s730_s24, %s871_s24  }
   0x4   : > { %s755_s30 = sadd.s32 1, %s686_s27   ;;  %s169_s8 = sadd.s32 1, %s682_s26 }
   0x5   : > { %s166_s9 = ssub.s32 %s686_s27, %s755_s30  ;;  %p179_p0 = scmp.ne.s32.totalorder %s682_s26, %s678_s25 }
   0x6   : > { %p167_p1 = scmp.eq.s32.totalorder %s166_s9, 0  ;;  %p180_p2 = scmp.eq.s32.totalorder %s751_s28, 1 }
   0x7   : > { %p185_p3 = scmp.ne.s32.totalorder %s678_s25, %s674_s24  ;;  %p186_p4 = scmp.eq.s32.totalorder %s561_s29, 1 }
   0x8   : > { %s766_s10 = scalar_select %p167_p1, %s682_s26, %s169_s8  }
   0x9   : > { %p768_p5 = por %p180_p2, %p179_p0  ;;  %p772_p6 = por %p186_p4, %p185_p3 }
   0xa   : > { %p564_p7 = scmp.ge.s32.totalorder %s686_s27, 1  ;;  %p259_p8 = scmp.lt.s32.totalorder %s686_s27, 3 }
   0xc   : > { %p260_p9 = pnand %p564_p7, %p259_p8 }
   0xd   : > { %p301_p10 = scmp.lt.s32.totalorder (!%p260_p9), %s751_s28, 1  ;;  %s292_s18 = sand.u32 (!%p260_p9), 1, %s678_s25  }
   0xe   : > { %263 = sbr.rel (%p260_p9) target bundleno = 415 (0x19f), region = 44  ;;  %s456_s22 = scalar_lea.hbm (!%p260_p9), %s867_s6, %s751_s28 }
   0xf   : > { %s293_s29 = scalar_lea.vmem (!%p260_p9), [#allocation2], %s292_s18 }
  0x10   : > { %s458_s8 = sshll.u32 (!%p260_p9), %s293_s29, 4  ;;  %s459_s8 = int_to_ptr.vmem [resolvable:$true] %s458_s8 }
  0x13   : > { %v366_v0 = vld [vmem:[%s865_s4] sm:$0x1]  ;;  %vm369_vm0 = vcmask 122880   ;;  %v321_v1 = vld [vmem:[%s862_s1 + $0x18] sm:$0xff]  ;;  %v320_v2 = vld [vmem:[%s862_s1 + $0x10] sm:$0xff]  ;;  %s793_s21 = scalar_select %p301_p10, %s751_s28, 1  ;;  %v367_v7 = vlaneseq }
  0x14   : > { %v370_v3 = vsel %vm369_vm0, %v366_v0, inf  ;;  %339 = vmatpush.msra.mxu0 %v321_v1  ;;  %v319_v4 = vld [vmem:[%s862_s1 + $0x8] sm:$0xff]  ;;  %v318_v5 = vld [vmem:[%s862_s1] sm:$0xff]  ;;  %vm323_vm1 = vcmask 261120   ;;  %v688_v9 = vmov 24   ;;  %v689_v47 = vmov 0.0  }
  0x15   : > { %371 = vmin.xlane.f32.xlu0 %v370_v3  ;;  %s303_s9 = scalar_lea.vmem %s861_s0, %s793_s21  ;;  %v802_v8 = vand.u32 127, %v367_v7  ;;  %615 = vset.pattern.permute.xlu2 %v688_v9  ;;  %v322_v15 = vld [vmem:[%s863_s2] sm:$0x1]  ;;  %v414_v21 = vshrl.u32 %v367_v7, 7  ;;  %s306_s17 = scalar_lea.vmem %s864_s3, %s793_s21 }
  0x16   : > { %340 = vmatpush.msra.mxu0 %v320_v2  ;;  %v317_v6 = vld [vmem:[%s303_s9] sm:$0x1]  ;;  %614 = vset.pattern.permute.xlu1 %v688_v9  ;;  %s572_s23 = smul.u32 24, %s793_s21  ;;  %s820_s9 = sshll.u32 %s456_s22, 4  ;;  %s461_s9 = int_to_ptr.hbm [resolvable:$true] %s820_s9 }
  0x17   : > { %v421_v22 = vadd.s32 8, %v414_v21  ;;  %v427_v35 = vadd.s32 16, %v414_v21  ;;  %v393_v49 = vld [vmem:[%s306_s17] sm:$0x1]  ;;  %s443_s28 = scalar_lea.sflag [#allocation3], %s292_s18  ;;  %s638_s16 = sshra.s32 %s461_s9, 4  ;;  %s639_s16 = int_to_ptr.hbm [resolvable:$true] %s638_s16 }
  0x18   : > { %341 = vmatpush.msra.mxu0 %v319_v4  ;;  %s311_s15 = scalar_lea.vmem %s866_s5, %s572_s23  ;;  %s640_s17 = scalar_lea.hbm %s639_s16, 1 }
  0x19   : > { %617 = vset.pattern.permute.xlu0 %v421_v22  ;;  %v409_v57 = vld [vmem:[%s311_s15] sm:$0xff]  ;;  %v410_v58 = vld [vmem:[%s311_s15 + $0x8] sm:$0xff]  ;;  %v411_v59 = vld [vmem:[%s311_s15 + $0x10] sm:$0xff]  ;;  %p641_p11 = scmp.ne.s32.totalorder %s639_s16, %s640_s17  ;;  %s644_s22 = scalar_lea.hbm %s867_s6, 2 }
  0x1a   : > { %342 = vmatpush.msra.mxu0 %v318_v5  ;;  %p645_p0 = scmp.lt.s32.totalorder %s639_s16, %s867_s6  ;;  %p646_p1 = scmp.lt.s32.totalorder %s644_s22, %s640_s17 }
  0x1b   : > { %567 = vmatmul.msk.f32.vlgmr.msra.gmra.mxu0 %vm323_vm1, %v317_v6  ;;  %p642_p12 = pnand %p641_p11, %p768_p5 }
  0x1c   : > { %p647_p2 = por %p646_p1, %p645_p0 }
  0x1d   : > { %p643_p13 = pneg %p642_p12 }
  0x1f   : > { %p648_p3 = pnand %p647_p2, %p643_p13 }
  0x88   : > { %v372_v10 = vpop.xlane.xlu0 %371 }
  0x89   : > { %vm373_vm2 = vcmp.eq.f32.partialorder %v366_v0, %v372_v10 }
  0x8a   : > { %v374_v11 = vsel %vm373_vm2, %v802_v8, 16 }
  0x8b   : > { %v375_v12 = vsel %vm369_vm0, %v374_v11, 2147483647 }
  0x8c   : > { %v377_v13 = vshra.s32 %v375_v12, 16  ;;  %v376_v36 = vand.u32 65535, %v375_v12 }
  0x8e   : > { %v379_v14 = vcvt.s32.f32 %v377_v13  ;;  %v378_v38 = vcvt.s32.f32 %v376_v36 }
  0x90   : > { %380 = vmin.xlane.f32.xlu0 %v379_v14 }
  0x98   : > { %v344_v16 = vpop.f32.mrf.mxu0 }
  0x99   : > { %v345_v17 = vadd.f32 %v344_v16, %v322_v15 }
  0x9b   : > { %v568_v18 = vmul.f32 -1.442695, %v345_v17  ;;  %v412_v28 = vperm.slane %v345_v17, 0 }
  0x9d   : > { %620 = vpow2.f32 %v568_v18 }
  0xa3   : > { %v621_v19 = vpop.eup %620 }
  0xa4   : > { %v350_v20 = vadd.f32 1.0, %v621_v19  ;;  %423 = vperm.xlu0 %617, %v412_v28  }
  0xa6   : > { %622 = vrcp.f32 %v350_v20  ;;  %v362_v25 = vand.u32 2147483648, %v350_v20  ;;  %vm356_vm3 = vweird.f32 %v350_v20  ;;  %v360_v27 = vand.u32 2147483647, %v350_v20 }
  0xa8   : > { %v363_v30 = vor.u32 1.1754944e-38, %v362_v25  ;;  %vm361_vm6 = vcmp.eq.f32.partialorder %v360_v27, 8.507059e+37 }
  0xac   : > { %v623_v23 = vpop.eup %622  ;;  %619 = vset.pattern.permute.xlu0 %v427_v35 }
  0xad   : > { %v352_v24 = vmul.f32 %v623_v23, %v350_v20  ;;  %vm357_vm4 = vweird.f32 %v623_v23 }
  0xae   : > { %vm358_vm5 = vmor %vm356_vm3, %vm357_vm4 }
  0xaf   : > { %v353_v26 = vsub.f32 1.0, %v352_v24 }
  0xb1   : > { %v354_v29 = vmul.f32 %v623_v23, %v353_v26 }
  0xb3   : > { %v355_v31 = vadd.f32 %v623_v23, %v354_v29 }
  0xb5   : > { %v359_v32 = vsel %vm358_vm5, %v623_v23, %v355_v31 }
  0xb6   : > { %v364_v33 = vsel %vm361_vm6, %v363_v30, %v359_v32 }
  0xb7   : > { %v400_v34 = vsub.f32 1.0, %v364_v33 }
  0xb9   : > { %403 = vperm.xlu2 %615, %v400_v34  }
  0xc1   : > { %616 = vset.pattern.permute.xlu2 %v414_v21 }
  0xc9   : > { %417 = vperm.xlu2 %616, %v412_v28  }
  0xd1   : > { %618 = vset.pattern.permute.xlu2 %v427_v35 }
  0xd9   : > { %429 = vperm.xlu2 %618, %v412_v28  }
 0x103   : > { %v381_v37 = vpop.xlane.xlu0 %380 }
 0x104   : > { %vm382_vm7 = vcmp.eq.f32.partialorder %v379_v14, %v381_v37  ;;  %v387_v41 = vcvt.f32.s32 %v381_v37 }
 0x105   : > { %v383_v39 = vsel %vm382_vm7, %v378_v38, inf }
 0x106   : > { %384 = vmin.xlane.f32.xlu1 %v383_v39  ;;  %v388_v44 = vshll.u32 %v387_v41, 16 }
 0x113   : > { %v404_v42 = vpop.permute.xlu2 %403 }
 0x116   : > { %v424_v56 = vpop.permute.xlu0 %423 }
 0x11f   : > { %396 = vperm.xlu1 %614, %v364_v33  }
 0x123   : > { %v418_v46 = vpop.permute.xlu2 %417 }
 0x133   : > { %v430_v55 = vpop.permute.xlu2 %429 }
 0x179   : > { %v385_v40 = vpop.xlane.xlu1 %384 }
 0x17a   : > { %v386_v43 = vcvt.f32.s32 %v385_v40 }
 0x17c   : > { %v389_v45 = vadd.s32 %v388_v44, %v386_v43 }
 0x17e   : > { %vm390_vm8 = vcmp.eq.s32.totalorder %v802_v8, %v389_v45 }
 0x17f   : > { %v569_v48 = vsel %vm390_vm8, 1.0, %v689_v47 }
 0x180   : > { %v406_v52 = vmul.f32 %v569_v48, %v404_v42 }
 0x191   : > { %v397_v50 = vpop.permute.xlu1 %396 }
 0x192   : > { %v399_v51 = vmul.f32 %v397_v50, %v393_v49 }
 0x194   : > { %v407_v53 = vadd.f32 %v406_v52, %v399_v51 }
 0x196   : > { %v431_v54 = vperm.slane %v407_v53, 0  ;;  %408 = vst.msk [vmem:[%s293_s29] sm:$0x1] %vm369_vm0, %v407_v53 }
 0x197   : > { %651 = shalt.err (!%p648_p3)
}
 0x198   : > { %573 = dma.vmem_to_hbm [thread:$0]  (%p768_p5), %s459_s8, 16, %s461_s9, %s443_s28   ;;  %v432_v60 = vmul.f32 %v431_v54, %v418_v46  ;;  %v433_v61 = vmul.f32 %v431_v54, %v424_v56  ;;  %v434_v62 = vmul.f32 %v431_v54, %v430_v55  ;;  %vm438_vm9 = vcmask 130048  }
 0x199   : > { %s316_s15 = scalar_lea.vmem %s868_s7, %s572_s23 }
 0x19a   : > { %v435_v63 = vadd.f32 %v432_v60, %v409_v57  ;;  %v436_v0 = vadd.f32 %v433_v61, %v410_v58  ;;  %v437_v1 = vadd.f32 %v434_v62, %v411_v59 }
 0x19c   : > { %439 = vst.msk [vmem:[%s316_s15] sm:$0xff] %vm438_vm9, %v435_v63 }
 0x19d   : > { %440 = vst.msk [vmem:[%s316_s15 + $0x8] sm:$0xff] %vm438_vm9, %v436_v0 }
 0x19e   : > { %441 = vst.msk [vmem:[%s316_s15 + $0x10] sm:$0xff] %vm438_vm9, %v437_v1 }
 0x19f PF: > { %p579_p4 = scmp.ge.s32.totalorder %s686_s27, 2  ;;  %s475_s11 = sand.u32 1, %s674_s24  }
 0x1a0   : > { %s476_s21 = scalar_lea.sflag [#allocation3], %s475_s11 }
 0x1a1   : > { %p576_p5 = pnand %p579_p4, %p772_p6 }
 0x1a3   : > { %p577_p7 = pneg %p576_p5 }
 0x1a5   : > { %669 = dma.done.wait (%p577_p7), %s476_s21, 16  }
 0x1a6   : > { %671 = vsyncadd (%p577_p7), %s476_s21, 4294967280  ;;  %p18_p8 = scmp.ge.s32.totalorder %s755_s30, 4   ;;  %s871_s24 = smov %s678_s25 }
 0x1a7   : > { %s872_s25 = smov %s682_s26  ;;  %s873_s26 = smov %s766_s10 }
 0x1a8   : > { %s874_s27 = smov %s755_s30  ;;  %20 = sbr.rel (!%p18_p8) target bundleno = 3 (0x3), region = 97 }
 0x1ad   :  { %489 = vsyncpa [#allocation3], 1 }
 0x1ae   :  { %491 = vsyncpa [#allocation3 + $0x1], 1 }

</bundles_post_ra>
